<compile_context>
chip_gen: v7x
topology: tpu7x:2x2x1
jax: 0.10.0
libtpu: 0.0.40
codegen_flags: <defaults>
</compile_context>

<pallas_src>
import functools

import jax
import jax.numpy as jnp
from jax.experimental import pallas as pl
from jax.experimental.pallas import tpu as pltpu


def _global_max_pool1d_kernel(x_ref, o_ref, acc_ref, *, lanes, num_chunks,
                              valid_tail, needs_mask, min_val):
    """x_ref: (1, TR, TL) input tile; o_ref: (1, 1, TR); acc_ref: (1, TR, lanes)."""
    l = pl.program_id(1)
    last = pl.num_programs(1) - 1

    # Init running-max accumulator at the start of every row-block reduction.
    @pl.when(l == 0)
    def _init():
        acc_ref[...] = jnp.full(acc_ref.shape, min_val, acc_ref.dtype)

    def fold(masked):
        acc = acc_ref[...]                 # (1, TR, lanes) — small, stays resident
        if masked:
            # 1-vreg lane index; broadcast happens inside the compare.
            lane_pos = jax.lax.broadcasted_iota(jnp.int32, (1, 1, lanes), 2)
        for j in range(num_chunks):
            start = j * lanes
            if masked and start >= valid_tail:
                break                      # chunk is entirely block padding: skip load
            # Per-chunk load straight from the ref (static slice, no pl.ds needed).
            chunk = x_ref[:, :, start:start + lanes]
            if masked and start + lanes > valid_tail:
                # Only the (single) boundary chunk pays the compare+select.
                chunk = jnp.where(lane_pos < (valid_tail - start), chunk, min_val)
            acc = jnp.maximum(acc, chunk)
        acc_ref[...] = acc

    if needs_mask:
        @pl.when(l < last)
        def _steady():
            fold(False)                    # unmasked steady-state fold

        @pl.when(l == last)
        def _ragged_tail():
            fold(True)                     # masked fold, last L block only
    else:
        fold(False)

    # Finalize: single cross-lane reduce, lane-dense (1, 1, TR) store.
    @pl.when(l == last)
    def _finalize():
        o_ref[...] = jnp.max(acc_ref[...], axis=-1)[:, None, :]


def _pick_row_tile(rows, tr_max):
    """Row-tile TR: multiple of 128 (or full extent); aims for >= 2 row blocks."""
    if rows <= 128:
        return rows
    if rows <= 2 * tr_max:
        half = -(-rows // 2)                       # ceil(rows / 2)
        return min(tr_max, -(-half // 128) * 128)  # round up to multiple of 128
    return tr_max


def _pick_len_tile(length, max_tl):
    """Length-tile TL and whether the last L block needs masking.

    TL is the full extent (small / already 128-aligned L) or a multiple of 128.
    Prefers a multiple-of-128 divisor of L (no mask, no short tail DMA) before
    falling back to the masked ragged-tail path.
    """
    if length <= 128:
        return length, False
    if length % 128 == 0 and length <= max_tl:
        return length, False
    base = (min(length, max_tl) // 128) * 128      # >= 128 here
    d = base
    while d >= max(128, base // 2):
        if length % d == 0:
            return d, False
        d -= 128
    return base, True


def global_max_pool1d(x: jax.Array, *, tr_max: int = 256,
                      block_budget_bytes: int = 8 << 20) -> jax.Array:
    """x: (N, C, L) -> (N, C, 1), max over the last axis (torch.max_pool1d(x, L))."""
    N, C, L = x.shape
    dtype = x.dtype
    R = N * C

    if jnp.issubdtype(dtype, jnp.floating):
        min_val = float("-inf")
    elif jnp.issubdtype(dtype, jnp.integer):
        min_val = int(jnp.iinfo(dtype).min)
    else:
        raise TypeError(f"unsupported dtype: {dtype}")

    itemsize = jnp.dtype(dtype).itemsize

    TR = _pick_row_tile(R, tr_max)
    # ~8 MiB input blocks (v7x-friendly), capped so the unrolled chunk loop
    # stays a reasonable length (<=128 chunks).
    max_tl = (block_budget_bytes // itemsize) // max(TR, 1)
    max_tl = max(128, min((max_tl // 128) * 128, 128 * 128))
    TL, needs_mask = _pick_len_tile(L, max_tl)

    if TL >= 128:
        lanes, num_chunks = 128, TL // 128
    else:                                          # tiny L: single full-extent chunk
        lanes, num_chunks = TL, 1

    num_l_blocks = pl.cdiv(L, TL)
    valid_tail = L - (num_l_blocks - 1) * TL       # static; only used when masked
    grid = (pl.cdiv(R, TR), num_l_blocks)

    kernel = functools.partial(
        _global_max_pool1d_kernel,
        lanes=lanes, num_chunks=num_chunks, valid_tail=valid_tail,
        needs_mask=needs_mask, min_val=min_val)

    # Explicit VMEM budget: 2x-buffered input blocks + accumulator + headroom.
    in_block_bytes = TR * TL * itemsize
    acc_bytes = TR * lanes * itemsize
    vmem_limit = 2 * in_block_bytes + 2 * acc_bytes + (8 << 20)
    vmem_limit = int(min(max(vmem_limit, 24 << 20), 48 << 20))

    x_flat = x.reshape(1, R, L)                    # free: merging leading dims

    out = pl.pallas_call(
        kernel,
        out_shape=jax.ShapeDtypeStruct((1, 1, R), dtype),
        grid_spec=pltpu.PrefetchScalarGridSpec(
            num_scalar_prefetch=0,
            grid=grid,
            in_specs=[pl.BlockSpec((1, TR, TL), lambda r, l: (0, r, l))],
            # Output block index independent of l -> accumulator-resident across
            # the reduction axis; rows on the lane axis (lane-dense store).
            out_specs=pl.BlockSpec((1, 1, TR), lambda r, l: (0, 0, r)),
            scratch_shapes=[pltpu.VMEM((1, TR, lanes), dtype)],
        ),
        compiler_params=pltpu.CompilerParams(
            dimension_semantics=("parallel", "arbitrary"),
            vmem_limit_bytes=vmem_limit),
    )(x_flat)

    # (1, 1, N*C) -> (N, C, 1): pure layout plumbing, preserves PyTorch contract.
    return out.reshape(N, C, 1)


if __name__ == "__main__":
    key = jax.random.PRNGKey(0)

    # Small shape consistent with the module's (N, C, L) input.
    N, C, L = 2, 4, 16
    x = jax.random.normal(key, (N, C, L), dtype=jnp.float32)
    out = global_max_pool1d(x)
    jax.block_until_ready(out)
    ref = jnp.max(x, axis=-1, keepdims=True)
    assert out.shape == (N, C, 1), out.shape
    assert jnp.allclose(out, ref), "mismatch vs reference (small shape)"

    # Modest shape exercising the tiled path with a shrunken block budget:
    # multiple row blocks (partial last one), multiple L blocks, masked ragged
    # tail, 128-lane chunk folding.
    N2, C2, L2 = 2, 160, 1184
    x2 = jax.random.normal(jax.random.PRNGKey(0), (N2, C2, L2), dtype=jnp.float32)
    out2 = global_max_pool1d(x2, block_budget_bytes=1 << 19)
    jax.block_until_ready(out2)
    ref2 = jnp.max(x2, axis=-1, keepdims=True)
    assert out2.shape == (N2, C2, 1), out2.shape
    assert jnp.allclose(out2, ref2), "mismatch vs reference (tiled shape)"

    print("KERNEL_OK")
</pallas_src>

<mosaic_0001>
module attributes {stable_mosaic.version = 11 : i64} {
  func.func @_global_max_pool1d_kernel(%arg0: i32, %arg1: i32, %arg2: memref<1x8x16xf32, #tpu.memory_space<vmem>>, %arg3: memref<1x1x8xf32, #tpu.memory_space<vmem>>, %arg4: memref<1x8x16xf32, #tpu.memory_space<vmem>>) attributes {dimension_semantics = [#tpu.dimension_semantics<parallel>, #tpu.dimension_semantics<arbitrary>], iteration_bounds = array<i64: 1, 1>, scalar_prefetch = 0 : i64, scratch_operands = 1 : i64, tpu.core_type = #tpu.core_type<tc>, window_params = [{transform_indices = @transform_0, window_bounds = array<i64: 1, 8, 16>}, {transform_indices = @transform_1, window_bounds = array<i64: 1, 1, 8>}]} {
    %c0_i32 = arith.constant 0 : i32
    %0 = arith.cmpi eq, %arg1, %c0_i32 : i32
    %1 = arith.extui %0 : i1 to i32
    %c0_i32_0 = arith.constant 0 : i32
    %2 = arith.cmpi ne, %1, %c0_i32_0 : i32
    scf.if %2 {
      %cst = arith.constant 0xFF800000 : f32
      %10 = vector.broadcast %cst : f32 to vector<1x8x16xf32>
      %c0_11 = arith.constant 0 : index
      %c0_12 = arith.constant 0 : index
      %c0_13 = arith.constant 0 : index
      %11 = vector.load %arg4[%c0_11, %c0_12, %c0_13] : memref<1x8x16xf32, #tpu.memory_space<vmem>>, vector<1x8x16xf32>
      tpu.vector_store %arg4[%c0_11, %c0_12, %c0_13], %10 {strides = array<i32>} : memref<1x8x16xf32, #tpu.memory_space<vmem>>, vector<1x8x16xf32>,
    } else {
    }
    %c0 = arith.constant 0 : index
    %c0_1 = arith.constant 0 : index
    %c0_2 = arith.constant 0 : index
    %3 = vector.load %arg4[%c0, %c0_1, %c0_2] : memref<1x8x16xf32, #tpu.memory_space<vmem>>, vector<1x8x16xf32>
    %c0_3 = arith.constant 0 : index
    %c0_4 = arith.constant 0 : index
    %c0_5 = arith.constant 0 : index
    %4 = vector.load %arg2[%c0_3, %c0_4, %c0_5] : memref<1x8x16xf32, #tpu.memory_space<vmem>>, vector<1x8x16xf32>
    %5 = arith.maximumf %3, %4 : vector<1x8x16xf32>
    %c0_6 = arith.constant 0 : index
    %c0_7 = arith.constant 0 : index
    %c0_8 = arith.constant 0 : index
    %6 = vector.load %arg4[%c0_6, %c0_7, %c0_8] : memref<1x8x16xf32, #tpu.memory_space<vmem>>, vector<1x8x16xf32>
    tpu.vector_store %arg4[%c0_6, %c0_7, %c0_8], %5 {strides = array<i32>} : memref<1x8x16xf32, #tpu.memory_space<vmem>>, vector<1x8x16xf32>,
    %c0_i32_9 = arith.constant 0 : i32
    %7 = arith.cmpi eq, %arg1, %c0_i32_9 : i32
    %8 = arith.extui %7 : i1 to i32
    %c0_i32_10 = arith.constant 0 : i32
    %9 = arith.cmpi ne, %8, %c0_i32_10 : i32
    scf.if %9 {
      %c0_11 = arith.constant 0 : index
      %c0_12 = arith.constant 0 : index
      %c0_13 = arith.constant 0 : index
      %10 = vector.load %arg4[%c0_11, %c0_12, %c0_13] : memref<1x8x16xf32, #tpu.memory_space<vmem>>, vector<1x8x16xf32>
      %cst = arith.constant dense<0xFF800000> : vector<1x8xf32>
      %11 = vector.multi_reduction <maximumf>, %10, %cst [2] : vector<1x8x16xf32> to vector<1x8xf32>
      %12 = vector.shape_cast %11 : vector<1x8xf32> to vector<1x1x8xf32>
      %c0_14 = arith.constant 0 : index
      %c0_15 = arith.constant 0 : index
      %c0_16 = arith.constant 0 : index
      %13 = vector.load %arg3[%c0_14, %c0_15, %c0_16] : memref<1x1x8xf32, #tpu.memory_space<vmem>>, vector<1x1x8xf32>
      tpu.vector_store %arg3[%c0_14, %c0_15, %c0_16], %12 {strides = array<i32>} : memref<1x1x8xf32, #tpu.memory_space<vmem>>, vector<1x1x8xf32>,
    } else {
    }
    return
  }
  func.func @transform_0(%arg0: i32, %arg1: i32) -> (i32, i32, i32) {
    %c0_i32 = arith.constant 0 : i32
    %c0_i32_0 = arith.constant 0 : i32
    return %c0_i32, %arg0, %arg1 : i32, i32, i32
  }
  func.func @transform_1(%arg0: i32, %arg1: i32) -> (i32, i32, i32) {
    %c0_i32 = arith.constant 0 : i32
    %c0_i32_0 = arith.constant 0 : i32
    %c0_i32_1 = arith.constant 0 : i32
    return %c0_i32, %c0_i32_0, %arg0 : i32, i32, i32
  }
}

</mosaic_0001>

<bundles_post_ra>
// kernel: tpu_custom_call.1
= control target key start
LH: loop header
LB: loop body
LE: loop exit
PB: predicated region body
PF: predicated region fallthrough
CT: control target
= control target key end

     0   :  { %6 = vsyncpa [#allocation4], 0  ;;  %s152_s0 = inlined_call_operand.hbm [shape: f32[1,8,16], index: 0, kind: input, shape index: {}]   ;;  %s153_s1 = inlined_call_operand.hbm [shape: f32[1,1,8], index: 1, kind: output, shape index: {}]  }
   0x1   :  { %7 = vsyncpa [#allocation5], 0  ;;  %s115_s6 = smov [#allocation3]   ;;  %s67_s10 = scalar_lea.hbm %s152_s0, 128 }
   0x2   :  { %s14_s7 = sshll.u32 %s115_s6, 4  ;;  %p68_p0 = scmp.ne.s32.totalorder %s152_s0, %s67_s10  ;;  %s15_s7 = int_to_ptr.vmem [resolvable:$true] %s14_s7 }
   0x3   :  { %p71_p1 = scmp.lt.u32.totalorder %s67_s10, %s152_s0 }
   0x5   :  { %p73_p2 = pnand %p71_p1, %p68_p0 }
   0x7   :  { %76 = shalt.err (!%p73_p2)
}
   0x8   :  { %s77_s15 = scalar_lea.vmem %s15_s7, 128  ;;  %p82_p4 = scmp.lt.s32.totalorder %s15_s7, %s15_s7 }
   0x9   :  { %p78_p3 = scmp.ne.s32.totalorder %s15_s7, %s77_s15  ;;  %p83_p5 = scmp.lt.s32.totalorder %s77_s15, %s77_s15 }
   0xb   :  { %p84_p6 = por %p83_p5, %p82_p4 }
   0xd   :  { %p85_p7 = pnand %p84_p6, %p78_p3 }
   0xf   :  { %88 = shalt.err (!%p85_p7)
}
  0x10   :  { %17 = dma.hbm_to_vmem [thread:$0]  %s152_s0, 128, %s15_s7, [#allocation4]  }
  0x11   :  { %111 = dma.done.wait [#allocation4], 128  }
  0x12   :  { %112 = vsyncadd [#allocation4], 4294967168  ;;  %vm25_vm0 = vcmask 130048   ;;  %v116_v0 = vmov -inf   ;;  %v28_v1 = vld [vmem:[#allocation3] sm:$0xff]  ;;  %v40_v6 = vlaneseq  ;;  %s117_s18 = smov [#allocation6]  }
  0x13   :  { %26 = vst.msk [vmem:[#allocation2] sm:$0xff] %vm25_vm0, %v116_v0  ;;  %s55_s19 = sshll.u32 %s117_s18, 4  ;;  %vm47_vm1 = vcmask 57344   ;;  %s56_s19 = int_to_ptr.vmem [resolvable:$true] %s55_s19 }
  0x14   :  { %v41_v7 = vand.u32 127, %v40_v6  ;;  %v43_v8 = vshrl.u32 %v40_v6, 7  ;;  %s89_s0 = scalar_lea.vmem %s56_s19, 16  ;;  %s93_s20 = scalar_lea.vmem %s56_s19, 32 }
  0x15   :  { %p90_p8 = scmp.ne.s32.totalorder %s56_s19, %s89_s0  ;;  %p94_p9 = scmp.lt.s32.totalorder %s56_s19, %s56_s19 }
  0x16   :  { %v44_v9 = vsub.s32 %v41_v7, %v43_v8  ;;  %p95_p10 = scmp.lt.s32.totalorder %s93_s20, %s89_s0 }
  0x18   :  { %p96_p11 = por %p95_p10, %p94_p9 }
  0x1a   :  { %v27_v2 = vld [vmem:[#allocation2] sm:$0xff]  ;;  %p97_p12 = pnand %p96_p11, %p90_p8 }
  0x1b   :  { %v29_v3 = vmax.f32 %v27_v2, %v28_v1 }
  0x1d   :  { %31 = vst.msk [vmem:[#allocation2] sm:$0xff] %vm25_vm0, %v29_v3 }
  0x24   :  { %v35_v4 = vld [vmem:[#allocation2] sm:$0xff] }
  0x25   :  { %v36_v5 = vsel %vm25_vm0, %v35_v4, -inf }
  0x26   :  { %37 = vmax.xlane.f32.xlu0 %v36_v5 }
  0xb3   :  { %v38_v10 = vpop.xlane.xlu0 %37 }
  0xb4   :  { %v45_v11 = vrot.slane %v38_v10, %v44_v9 }
  0xb6   :  { %48 = vst.msk [vmem:[#allocation6] sm:$0x1] %vm47_vm1, %v45_v11 }
  0xb7   :  { %100 = shalt.err (!%p97_p12)
}
  0xb8   :  { %s101_s23 = scalar_lea.hbm %s153_s1, 16 }
  0xb9   :  { %p102_p13 = scmp.ne.s32.totalorder %s153_s1, %s101_s23  ;;  %p105_p0 = scmp.lt.u32.totalorder %s101_s23, %s153_s1 }
  0xbb   :  { %p107_p1 = pnand %p105_p0, %p102_p13 }
  0xbd   :  { %110 = shalt.err (!%p107_p1)
}
  0xbe   :  { %58 = dma.vmem_to_hbm [thread:$0]  %s56_s19, 16, %s153_s1, [#allocation5]  }
  0xbf   :  { %113 = dma.done.wait [#allocation5], 16  }
  0xc0   :  { %114 = vsyncadd [#allocation5], 4294967280 }
  0xc1   :  { %62 = vsyncpa [#allocation4], 1 }
  0xc2   :  { %63 = vsyncpa [#allocation5], 1 }

</bundles_post_ra>
